<compile_context>
chip_gen: v7x
topology: tpu7x:2x2x1
jax: 0.10.0
libtpu: 0.0.40
codegen_flags: <defaults>
</compile_context>

<pallas_src>
import functools

import jax
import jax.numpy as jnp
from jax.experimental import pallas as pl
from jax.experimental.pallas import tpu as pltpu


STATE_DIM = 24        # walker: orientations(14) + height(1) + velocity(9)
ACTION_DIM = 6        # walker action dim
MAX_ACTION = 1.0

H1, H2 = 400, 300             # logical hidden sizes (match the PyTorch module)
H1_PAD, H2_PAD = 512, 384     # zero-padded to multiples of 128 (lane-aligned)
A_PAD = 128                   # padded output lane width (lane-dense stores)


def _round_up(x, m):
    return (x + m - 1) // m * m


def actor_kernel(x_ref, w1_ref, b1_ref, w2_ref, b2_ref, w3_ref, b3_ref, out_ref):
    # Layer 1: (TB, 24) @ (24, 512) -> bf16 MXU operands, f32 accumulate.
    x = x_ref[...].astype(jnp.bfloat16)
    h = jnp.dot(x, w1_ref[...], preferred_element_type=jnp.float32) + b1_ref[...]
    h = jnp.maximum(h, 0.0)                              # relu(layer_1), f32 VPU

    # Layer 2: (TB, 512) @ (512, 384)
    h = jnp.dot(h.astype(jnp.bfloat16), w2_ref[...],
                preferred_element_type=jnp.float32) + b2_ref[...]
    h = jnp.maximum(h, 0.0)                              # relu(layer_2), f32 VPU

    # Layer 3: (TB, 384) @ (384, 128), then max_action * tanh (f32, EUP).
    a = jnp.dot(h.astype(jnp.bfloat16), w3_ref[...],
                preferred_element_type=jnp.float32) + b3_ref[...]
    out_ref[...] = (MAX_ACTION * jnp.tanh(a)).astype(out_ref.dtype)


@functools.partial(jax.jit, static_argnames=("tb",))
def actor_forward(x, params, tb=512):
    """Pallas equivalent of Actor.forward(x) -> (B, action_dim)."""
    B, D = x.shape
    TB = min(tb, _round_up(B, 8))          # small batches: one sublane-aligned tile
    B_pad = _round_up(B, TB)
    if B_pad != B:
        x = jnp.pad(x, ((0, B_pad - B), (0, 0)))
    grid = (B_pad // TB,)

    w1, b1 = params["w1"], params["b1"]
    w2, b2 = params["w2"], params["b2"]
    w3, b3 = params["w3"], params["b3"]

    def resident(arr):
        # Full-array block that stays VMEM-resident across all batch tiles.
        return pl.BlockSpec(arr.shape, lambda i: (0, 0))

    out = pl.pallas_call(
        actor_kernel,
        out_shape=jax.ShapeDtypeStruct((B_pad, A_PAD), jnp.float32),
        grid=grid,
        in_specs=[
            pl.BlockSpec((TB, D), lambda i: (i, 0)),     # x: tiled over batch
            resident(w1), resident(b1),
            resident(w2), resident(b2),
            resident(w3), resident(b3),
        ],
        out_specs=pl.BlockSpec((TB, A_PAD), lambda i: (i, 0)),
        compiler_params=pltpu.CompilerParams(
            dimension_semantics=("parallel",)),          # megacore on v7x
    )(x, w1, b1, w2, b2, w3, b3)

    # Strip batch padding and the padded output lanes.
    return out[:B, :ACTION_DIM]


def _init_linear_padded(key, in_dim, out_dim, in_pad, out_pad):
    """PyTorch nn.Linear default init U(-1/sqrt(fan_in), 1/sqrt(fan_in)),
    stored as (in, out) and zero-padded to lane-aligned shapes."""
    kw, kb = jax.random.split(key)
    bound = 1.0 / jnp.sqrt(jnp.float32(in_dim))
    w = jax.random.uniform(kw, (in_dim, out_dim), jnp.float32, -bound, bound)
    b = jax.random.uniform(kb, (1, out_dim), jnp.float32, -bound, bound)
    w_pad = jnp.zeros((in_pad, out_pad), jnp.float32).at[:in_dim, :out_dim].set(w)
    b_pad = jnp.zeros((1, out_pad), jnp.float32).at[:, :out_dim].set(b)
    return w, b, w_pad, b_pad


def make_actor_params(key):
    """Returns (reference f32 logical params, padded kernel params with bf16 weights)."""
    k1, k2, k3 = jax.random.split(key, 3)
    w1, b1, w1p, b1p = _init_linear_padded(k1, STATE_DIM, H1, STATE_DIM, H1_PAD)
    w2, b2, w2p, b2p = _init_linear_padded(k2, H1, H2, H1_PAD, H2_PAD)
    w3, b3, w3p, b3p = _init_linear_padded(k3, H2, ACTION_DIM, H2_PAD, A_PAD)
    ref_params = {"w1": w1, "b1": b1, "w2": w2, "b2": b2, "w3": w3, "b3": b3}
    kern_params = {
        "w1": w1p.astype(jnp.bfloat16), "b1": b1p,   # weights bf16 (MXU operands)
        "w2": w2p.astype(jnp.bfloat16), "b2": b2p,   # biases stay f32 (VPU adds)
        "w3": w3p.astype(jnp.bfloat16), "b3": b3p,
    }
    return ref_params, kern_params


def actor_forward_ref(x, p):
    """Plain-JAX f32 reference of the PyTorch forward, for verification."""
    h = jax.nn.relu(x @ p["w1"] + p["b1"])
    h = jax.nn.relu(h @ p["w2"] + p["b2"])
    return MAX_ACTION * jnp.tanh(h @ p["w3"] + p["b3"])


if __name__ == "__main__":
    key = jax.random.PRNGKey(0)
    k_params, k_x = jax.random.split(key)

    batch = 2
    ref_params, kern_params = make_actor_params(k_params)
    x = jax.random.normal(k_x, (batch, STATE_DIM), jnp.float32)

    a = actor_forward(x, kern_params)
    jax.block_until_ready(a)

    a_ref = actor_forward_ref(x, ref_params)
    assert a.shape == (batch, ACTION_DIM)
    # bf16 MXU operands vs. f32 reference -> loosened tolerance (tanh-bounded output).
    assert jnp.allclose(a, a_ref, atol=5e-2, rtol=5e-2), \
        f"max abs diff = {float(jnp.max(jnp.abs(a - a_ref)))}"

    print("KERNEL_OK")
</pallas_src>

<mosaic_0001>
module attributes {stable_mosaic.version = 11 : i64} {
  func.func @actor_kernel(%arg0: i32, %arg1: memref<8x24xf32, #tpu.memory_space<vmem>>, %arg2: memref<24x512xbf16, #tpu.memory_space<vmem>>, %arg3: memref<1x512xf32, #tpu.memory_space<vmem>>, %arg4: memref<512x384xbf16, #tpu.memory_space<vmem>>, %arg5: memref<1x384xf32, #tpu.memory_space<vmem>>, %arg6: memref<384x128xbf16, #tpu.memory_space<vmem>>, %arg7: memref<1x128xf32, #tpu.memory_space<vmem>>, %arg8: memref<8x128xf32, #tpu.memory_space<vmem>>) attributes {dimension_semantics = [#tpu.dimension_semantics<parallel>], iteration_bounds = array<i64: 1>, scalar_prefetch = 0 : i64, scratch_operands = 0 : i64, tpu.core_type = #tpu.core_type<tc>, window_params = [{transform_indices = @transform_0, window_bounds = array<i64: 8, 24>}, {pipeline_mode = #tpu.pipeline_mode<synchronous>, transform_indices = @transform_1, window_bounds = array<i64: 24, 512>}, {pipeline_mode = #tpu.pipeline_mode<synchronous>, transform_indices = @transform_2, window_bounds = array<i64: 1, 512>}, {pipeline_mode = #tpu.pipeline_mode<synchronous>, transform_indices = @transform_3, window_bounds = array<i64: 512, 384>}, {pipeline_mode = #tpu.pipeline_mode<synchronous>, transform_indices = @transform_4, window_bounds = array<i64: 1, 384>}, {pipeline_mode = #tpu.pipeline_mode<synchronous>, transform_indices = @transform_5, window_bounds = array<i64: 384, 128>}, {pipeline_mode = #tpu.pipeline_mode<synchronous>, transform_indices = @transform_6, window_bounds = array<i64: 1, 128>}, {transform_indices = @transform_7, window_bounds = array<i64: 8, 128>}]} {
    %c0 = arith.constant 0 : index
    %c0_0 = arith.constant 0 : index
    %0 = vector.load %arg1[%c0, %c0_0] : memref<8x24xf32, #tpu.memory_space<vmem>>, vector<8x24xf32>
    %1 = arith.truncf %0 : vector<8x24xf32> to vector<8x24xbf16>
    %c0_1 = arith.constant 0 : index
    %c0_2 = arith.constant 0 : index
    %2 = vector.load %arg2[%c0_1, %c0_2] : memref<24x512xbf16, #tpu.memory_space<vmem>>, vector<24x512xbf16>
    %cst = arith.constant dense<0.000000e+00> : vector<8x512xf32>
    %3 = tpu.matmul %1, %2, %cst {dimension_numbers = #tpu.dot_dimension_numbers<[1], [0], [0], [1], [0, 0, 1, 1], [], []>} : vector<8x24xbf16>, vector<24x512xbf16>, vector<8x512xf32> -> vector<8x512xf32>
    %c0_3 = arith.constant 0 : index
    %c0_4 = arith.constant 0 : index
    %4 = vector.load %arg3[%c0_3, %c0_4] : memref<1x512xf32, #tpu.memory_space<vmem>>, vector<1x512xf32>
    %5 = vector.broadcast %4 : vector<1x512xf32> to vector<8x512xf32>
    %6 = arith.addf %3, %5 : vector<8x512xf32>
    %cst_5 = arith.constant 0.000000e+00 : f32
    %7 = vector.broadcast %cst_5 : f32 to vector<8x512xf32>
    %8 = arith.maximumf %6, %7 : vector<8x512xf32>
    %9 = arith.truncf %8 : vector<8x512xf32> to vector<8x512xbf16>
    %c0_6 = arith.constant 0 : index
    %c0_7 = arith.constant 0 : index
    %10 = vector.load %arg4[%c0_6, %c0_7] : memref<512x384xbf16, #tpu.memory_space<vmem>>, vector<512x384xbf16>
    %cst_8 = arith.constant dense<0.000000e+00> : vector<8x384xf32>
    %11 = tpu.matmul %9, %10, %cst_8 {dimension_numbers = #tpu.dot_dimension_numbers<[1], [0], [0], [1], [0, 0, 1, 1], [], []>} : vector<8x512xbf16>, vector<512x384xbf16>, vector<8x384xf32> -> vector<8x384xf32>
    %c0_9 = arith.constant 0 : index
    %c0_10 = arith.constant 0 : index
    %12 = vector.load %arg5[%c0_9, %c0_10] : memref<1x384xf32, #tpu.memory_space<vmem>>, vector<1x384xf32>
    %13 = vector.broadcast %12 : vector<1x384xf32> to vector<8x384xf32>
    %14 = arith.addf %11, %13 : vector<8x384xf32>
    %cst_11 = arith.constant 0.000000e+00 : f32
    %15 = vector.broadcast %cst_11 : f32 to vector<8x384xf32>
    %16 = arith.maximumf %14, %15 : vector<8x384xf32>
    %17 = arith.truncf %16 : vector<8x384xf32> to vector<8x384xbf16>
    %c0_12 = arith.constant 0 : index
    %c0_13 = arith.constant 0 : index
    %18 = vector.load %arg6[%c0_12, %c0_13] : memref<384x128xbf16, #tpu.memory_space<vmem>>, vector<384x128xbf16>
    %cst_14 = arith.constant dense<0.000000e+00> : vector<8x128xf32>
    %19 = tpu.matmul %17, %18, %cst_14 {dimension_numbers = #tpu.dot_dimension_numbers<[1], [0], [0], [1], [0, 0, 1, 1], [], []>} : vector<8x384xbf16>, vector<384x128xbf16>, vector<8x128xf32> -> vector<8x128xf32>
    %c0_15 = arith.constant 0 : index
    %c0_16 = arith.constant 0 : index
    %20 = vector.load %arg7[%c0_15, %c0_16] : memref<1x128xf32, #tpu.memory_space<vmem>>, vector<1x128xf32>
    %21 = vector.broadcast %20 : vector<1x128xf32> to vector<8x128xf32>
    %22 = arith.addf %19, %21 : vector<8x128xf32>
    %23 = math.tanh %22 : vector<8x128xf32>
    %cst_17 = arith.constant 1.000000e+00 : f32
    %24 = vector.broadcast %cst_17 : f32 to vector<8x128xf32>
    %25 = arith.mulf %24, %23 : vector<8x128xf32>
    %c0_18 = arith.constant 0 : index
    %c0_19 = arith.constant 0 : index
    %26 = vector.load %arg8[%c0_18, %c0_19] : memref<8x128xf32, #tpu.memory_space<vmem>>, vector<8x128xf32>
    tpu.vector_store %arg8[%c0_18, %c0_19], %25 {strides = array<i32>} : memref<8x128xf32, #tpu.memory_space<vmem>>, vector<8x128xf32>,
    return
  }
  func.func @transform_0(%arg0: i32) -> (i32, i32) {
    %c0_i32 = arith.constant 0 : i32
    %c0_i32_0 = arith.constant 0 : i32
    return %arg0, %c0_i32 : i32, i32
  }
  func.func @transform_1(%arg0: i32) -> (i32, i32) {
    %c0_i32 = arith.constant 0 : i32
    %c0_i32_0 = arith.constant 0 : i32
    %c0_i32_1 = arith.constant 0 : i32
    return %c0_i32, %c0_i32_0 : i32, i32
  }
  func.func @transform_2(%arg0: i32) -> (i32, i32) {
    %c0_i32 = arith.constant 0 : i32
    %c0_i32_0 = arith.constant 0 : i32
    %c0_i32_1 = arith.constant 0 : i32
    return %c0_i32, %c0_i32_0 : i32, i32
  }
  func.func @transform_3(%arg0: i32) -> (i32, i32) {
    %c0_i32 = arith.constant 0 : i32
    %c0_i32_0 = arith.constant 0 : i32
    %c0_i32_1 = arith.constant 0 : i32
    return %c0_i32, %c0_i32_0 : i32, i32
  }
  func.func @transform_4(%arg0: i32) -> (i32, i32) {
    %c0_i32 = arith.constant 0 : i32
    %c0_i32_0 = arith.constant 0 : i32
    %c0_i32_1 = arith.constant 0 : i32
    return %c0_i32, %c0_i32_0 : i32, i32
  }
  func.func @transform_5(%arg0: i32) -> (i32, i32) {
    %c0_i32 = arith.constant 0 : i32
    %c0_i32_0 = arith.constant 0 : i32
    %c0_i32_1 = arith.constant 0 : i32
    return %c0_i32, %c0_i32_0 : i32, i32
  }
  func.func @transform_6(%arg0: i32) -> (i32, i32) {
    %c0_i32 = arith.constant 0 : i32
    %c0_i32_0 = arith.constant 0 : i32
    %c0_i32_1 = arith.constant 0 : i32
    return %c0_i32, %c0_i32_0 : i32, i32
  }
  func.func @transform_7(%arg0: i32) -> (i32, i32) {
    %c0_i32 = arith.constant 0 : i32
    %c0_i32_0 = arith.constant 0 : i32
    return %arg0, %c0_i32 : i32, i32
  }
}

</mosaic_0001>

<bundles_post_ra>
// kernel: actor_forward.1
= control target key start
LH: loop header
LB: loop body
LE: loop exit
PB: predicated region body
PF: predicated region fallthrough
CT: control target
= control target key end

     0   :  { %12 = vsyncpa [#allocation3], 0  ;;  %s1961_s0 = inlined_call_operand.vmem [shape: f32[8,24], index: 0, kind: input, shape index: {}]   ;;  %s1962_s1 = inlined_call_operand.hbm [shape: bf16[24,512], index: 1, kind: input, shape index: {}]   ;;  %s1963_s2 = inlined_call_operand.vmem [shape: f32[1,512], index: 2, kind: input, shape index: {}]   ;;  %s1964_s3 = inlined_call_operand.hbm [shape: bf16[512,384], index: 3, kind: input, shape index: {}]   ;;  %s1965_s4 = inlined_call_operand.vmem [shape: f32[1,384], index: 4, kind: input, shape index: {}]   ;;  %s1966_s5 = inlined_call_operand.hbm [shape: bf16[384,128], index: 5, kind: input, shape index: {}]   ;;  %s1967_s6 = inlined_call_operand.vmem [shape: f32[1,128], index: 6, kind: input, shape index: {}]   ;;  %s1968_s7 = inlined_call_operand.vmem [shape: f32[8,128], index: 7, kind: output, shape index: {}]  }
   0x1   :  { %13 = vsyncpa [#allocation5], 0  ;;  %s1827_s24 = smov [#allocation4]   ;;  %s1757_s28 = scalar_lea.hbm %s1964_s3, 12288 }
   0x2   :  { %s35_s25 = sshll.u32 %s1827_s24, 4  ;;  %p1758_p0 = scmp.ne.s32.totalorder %s1964_s3, %s1757_s28  ;;  %s36_s25 = int_to_ptr.vmem [resolvable:$true] %s35_s25 }
   0x3   :  { %p1761_p1 = scmp.lt.u32.totalorder %s1757_s28, %s1964_s3 }
   0x5   :  { %p1763_p2 = pnand %p1761_p1, %p1758_p0 }
   0x7   :  { %1766 = shalt.err (!%p1763_p2)
}
   0x8   :  { %s1767_s10 = scalar_lea.vmem %s36_s25, 12288  ;;  %p1772_p4 = scmp.lt.s32.totalorder %s36_s25, %s36_s25 }
   0x9   :  { %p1768_p3 = scmp.ne.s32.totalorder %s36_s25, %s1767_s10  ;;  %p1773_p5 = scmp.lt.s32.totalorder %s1767_s10, %s1767_s10 }
   0xb   :  { %p1774_p6 = por %p1773_p5, %p1772_p4 }
   0xd   :  { %p1775_p7 = pnand %p1774_p6, %p1768_p3 }
   0xf   :  { %1778 = shalt.err (!%p1775_p7)
}
  0x10   :  { %s1828_s11 = smov 192   ;;  %s1829_s12 = smov 12  }
  0x11   :  { %41 = dma.hbm_to_vmem [thread:$0]  %s1964_s3, 12288, %s36_s25, [#allocation5], %s1828_s11, %s1828_s11, %s1829_s12  }
  0x12   :  { %s1830_s15 = smov [#allocation2]   ;;  %s1779_s19 = scalar_lea.hbm %s1962_s1, 768 }
  0x13   :  { %s21_s16 = sshll.u32 %s1830_s15, 4  ;;  %p1780_p8 = scmp.ne.s32.totalorder %s1962_s1, %s1779_s19  ;;  %s22_s16 = int_to_ptr.vmem [resolvable:$true] %s21_s16 }
  0x14   :  { %p1783_p9 = scmp.lt.u32.totalorder %s1779_s19, %s1962_s1 }
  0x16   :  { %p1785_p10 = pnand %p1783_p9, %p1780_p8 }
  0x18   :  { %1788 = shalt.err (!%p1785_p10)
}
  0x19   :  { %s1789_s24 = scalar_lea.vmem %s22_s16, 768  ;;  %p1794_p12 = scmp.lt.s32.totalorder %s22_s16, %s22_s16 }
  0x1a   :  { %p1790_p11 = scmp.ne.s32.totalorder %s22_s16, %s1789_s24  ;;  %p1795_p13 = scmp.lt.s32.totalorder %s1789_s24, %s1789_s24 }
  0x1c   :  { %p1796_p0 = por %p1795_p13, %p1794_p12 }
  0x1e   :  { %p1797_p1 = pnand %p1796_p0, %p1790_p11 }
  0x20   :  { %1800 = shalt.err (!%p1797_p1)
}
  0x21   :  { %s1831_s3 = smov 256   ;;  %s1832_s25 = smov 16  }
  0x22   :  { %27 = dma.hbm_to_vmem [thread:$0]  %s1962_s1, 768, %s22_s16, [#allocation3], %s1831_s3, %s1831_s3, %s1832_s25  }
  0x23   :  { %s1833_s28 = smov [#allocation6]   ;;  %s1801_s9 = scalar_lea.hbm %s1966_s5, 3072 }
  0x24   :  { %s49_s29 = sshll.u32 %s1833_s28, 4  ;;  %p1802_p2 = scmp.ne.s32.totalorder %s1966_s5, %s1801_s9  ;;  %s50_s29 = int_to_ptr.vmem [resolvable:$true] %s49_s29 }
  0x25   :  { %p1805_p3 = scmp.lt.u32.totalorder %s1801_s9, %s1966_s5 }
  0x27   :  { %p1807_p4 = pnand %p1805_p3, %p1802_p2 }
  0x29   :  { %1810 = shalt.err (!%p1807_p4)
}
  0x2a   :  { %s1811_s14 = scalar_lea.vmem %s50_s29, 3072  ;;  %p1816_p6 = scmp.lt.s32.totalorder %s50_s29, %s50_s29 }
  0x2b   :  { %p1812_p5 = scmp.ne.s32.totalorder %s50_s29, %s1811_s14  ;;  %p1817_p7 = scmp.lt.s32.totalorder %s1811_s14, %s1811_s14 }
  0x2d   :  { %p1818_p8 = por %p1817_p7, %p1816_p6 }
  0x2f   :  { %p1819_p9 = pnand %p1818_p8, %p1812_p5 }
  0x31   :  { %1822 = shalt.err (!%p1819_p9)
}
  0x32   :  { %s1834_s1 = smov 64   ;;  %s1835_s15 = smov 4  }
  0x33   :  { %55 = dma.hbm_to_vmem [thread:$0]  %s1966_s5, 3072, %s50_s29, [#allocation5], %s1834_s1, %s1834_s1, %s1835_s15  }
  0x34   :  { %1823 = dma.done.wait [#allocation3], 768  }
  0x35   :  { %1824 = vsyncadd [#allocation3], 4294966528 }
  0x36   :  { %1825 = dma.done.wait [#allocation5], 15360  }
  0x37   :  { %1826 = vsyncadd [#allocation5], 4294951936  ;;  %v1836_v0 = vmov 0   ;;  %v1593_v1 = vld [vmem:[#allocation2 + $0x4] ss:$16 sps:$4 sm:$0xff]   ;;  %vm132_vm0 = vcmask 1043456  }
  0x38   :  { %177 = vmatprep.mubr.bf16.mxu0 %v1836_v0  ;;  %218 = vmatprep.mubr.bf16.mxu1 %v1836_v0  ;;  %v1595_v2 = vld [vmem:[#allocation2] ss:$16 sps:$4 sm:$0xff]   ;;  %v1598_v7 = vld [vmem:[#allocation2 + $0xc] ss:$16 sps:$4 sm:$0xff]   ;;  %v1600_v8 = vld [vmem:[#allocation2 + $0x8] ss:$16 sps:$4 sm:$0xff]  }
  0x39   :  { %v74_v3 = vld [vmem:[#allocation2 + $0x20] sm:$0xff]  ;;  %145 = vmatprep.subr.bf16.mxu0 %v1593_v1  ;;  %v75_v9 = vld [vmem:[#allocation2 + $0x28] sm:$0xff]  ;;  %186 = vmatprep.subr.bf16.mxu1 %v1598_v7  ;;  %vm128_vm1 = vcmask 195584   ;;  %v1603_v16 = vld [vmem:[#allocation4] ss:$12 sps:$4 sm:$0xff]   ;;  %v78_v1 = vlaneseq  ;;  %vm1838_vm2 = vmmov 0  }
  0x3a   :  { %v68_v4 = vld [vmem:[%s1961_s0] sm:$0xff]  ;;  %v1352_v5 = vcombine.high %v74_v3, %v74_v3  ;;  %v1351_v6 = vcombine.low %v74_v3, %v74_v3  ;;  %146 = vmatpush1.bf16.msra.mxu0 %v1595_v2  ;;  %v1354_v11 = vcombine.high %v75_v9, %v75_v9  ;;  %v1353_v12 = vcombine.low %v75_v9, %v75_v9  ;;  %v1608_v17 = vld [vmem:[#allocation4 + $0x1c] ss:$12 sps:$4 sm:$0xff]   ;;  %v1606_v18 = vld [vmem:[#allocation4 + $0x18] ss:$12 sps:$4 sm:$0xff]  }
  0x3b   :  { %v1605_v13 = vld [vmem:[#allocation4 + $0x4] ss:$12 sps:$4 sm:$0xff]   ;;  %187 = vmatpush1.bf16.msra.mxu1 %v1600_v8  ;;  %v69_v14 = vpack.c.bf16 %v68_v4, %v68_v4  ;;  %v1611_v19 = vld [vmem:[#allocation4 + $0x34] ss:$12 sps:$4 sm:$0xff]   ;;  %v1614_v21 = vld [vmem:[#allocation4 + $0x4c] ss:$12 sps:$4 sm:$0xff]  }
  0x3c   :  { %1355 = vmatprep.subr.msk.bf16.mxu0 %vm132_vm0, %v1352_v5  ;;  %v134_v10 = vsel %vm132_vm0, %v1351_v6, 0  ;;  %1357 = vmatprep.subr.msk.bf16.mxu1 %vm132_vm0, %v1354_v11  ;;  %v140_v15 = vsel %vm132_vm0, %v1353_v12, 0  ;;  %v1609_v20 = vld [vmem:[#allocation4 + $0x30] ss:$12 sps:$4 sm:$0xff]   ;;  %v1630_v22 = vld [vmem:[#allocation4 + $0xc8] ss:$12 sps:$4 sm:$0xff]  }
  0x3d   :  { %v1631_v23 = vld [vmem:[#allocation4 + $0x8] ss:$12 sps:$4 sm:$0xff]   ;;  %v1617_v25 = vld [vmem:[#allocation4 + $0x64] ss:$12 sps:$4 sm:$0xff]   ;;  %v1635_v26 = vld [vmem:[#allocation4 + $0xe0] ss:$12 sps:$4 sm:$0xff]  }
  0x3e   :  { %148 = vmatpush1.bf16.msra.mxu0 %v134_v10  ;;  %v1612_v24 = vld [vmem:[#allocation4 + $0x48] ss:$12 sps:$4 sm:$0xff]   ;;  %v1636_v27 = vld [vmem:[#allocation4 + $0x20] ss:$12 sps:$4 sm:$0xff]   ;;  %v1640_v30 = vld [vmem:[#allocation4 + $0xf8] ss:$12 sps:$4 sm:$0xff]  }
  0x3f   :  { %892 = vmatprep.subr.bf16.mxu0 %v1605_v13  ;;  %189 = vmatpush1.bf16.msra.mxu1 %v140_v15  ;;  %v1615_v28 = vld [vmem:[#allocation4 + $0x60] ss:$12 sps:$4 sm:$0xff]   ;;  %v1620_v29 = vld [vmem:[#allocation4 + $0x7c] ss:$12 sps:$4 sm:$0xff]   ;;  %v1641_v31 = vld [vmem:[#allocation4 + $0x38] ss:$12 sps:$4 sm:$0xff]  }
  0x40   :  { %1480 = vmatprep.subr.bf16.mxu1 %v1630_v22  ;;  %v1618_v32 = vld [vmem:[#allocation4 + $0x78] ss:$12 sps:$4 sm:$0xff]   ;;  %v1645_v33 = vld [vmem:[#allocation4 + $0x110] ss:$12 sps:$4 sm:$0xff]   ;;  %v1623_v35 = vld [vmem:[#allocation4 + $0x94] ss:$12 sps:$4 sm:$0xff]  }
  0x41   :  { %1356 = vmatmul.mubr.msk.bf16.vlgmr.msra.gmra.mrb[0].mxu0 %vm128_vm1, %v69_v14  ;;  %v1646_v34 = vld [vmem:[#allocation4 + $0x50] ss:$12 sps:$4 sm:$0xff]   ;;  %v1650_v36 = vld [vmem:[#allocation4 + $0x128] ss:$12 sps:$4 sm:$0xff]   ;;  %v1626_v39 = vld [vmem:[#allocation4 + $0xac] ss:$12 sps:$4 sm:$0xff]  }
  0x42   :  { %893 = vmatpush1.bf16.msra.mxu0 %v1603_v16  ;;  %1358 = vmatmul.mubr.msk.bf16.vlgmr.msra.gmra.mrb[0].mxu1 %vm128_vm1, %v69_v14  ;;  %v1621_v37 = vld [vmem:[#allocation4 + $0x90] ss:$12 sps:$4 sm:$0xff]   ;;  %v1651_v38 = vld [vmem:[#allocation4 + $0x68] ss:$12 sps:$4 sm:$0xff]   ;;  %v1655_v41 = vld [vmem:[#allocation4 + $0x140] ss:$12 sps:$4 sm:$0xff]  }
  0x43   :  { %894 = vmatprep.subr.bf16.mxu0 %v1608_v17  ;;  %1481 = vmatpush3.bf16.msra.mxu1 %v1631_v23  ;;  %v1624_v40 = vld [vmem:[#allocation4 + $0xa8] ss:$12 sps:$4 sm:$0xff]   ;;  %v1629_v42 = vld [vmem:[#allocation4 + $0xc4] ss:$12 sps:$4 sm:$0xff]   ;;  %v1656_v43 = vld [vmem:[#allocation4 + $0x80] ss:$12 sps:$4 sm:$0xff]  }
  0x44   :  { %1482 = vmatprep.subr.bf16.mxu1 %v1635_v26  ;;  %v1627_v44 = vld [vmem:[#allocation4 + $0xc0] ss:$12 sps:$4 sm:$0xff]   ;;  %v1634_v45 = vld [vmem:[#allocation4 + $0xdc] ss:$12 sps:$4 sm:$0xff]   ;;  %v1632_v46 = vld [vmem:[#allocation4 + $0xd8] ss:$12 sps:$4 sm:$0xff]  }
  0x45   :  { %v1639_v47 = vld [vmem:[#allocation4 + $0xf4] ss:$12 sps:$4 sm:$0xff]   ;;  %v1637_v48 = vld [vmem:[#allocation4 + $0xf0] ss:$12 sps:$4 sm:$0xff]   ;;  %v1644_v49 = vld [vmem:[#allocation4 + $0x10c] ss:$12 sps:$4 sm:$0xff]  }
  0x46   :  { %895 = vmatpush1.bf16.msra.mxu0 %v1606_v18  ;;  %v1642_v50 = vld [vmem:[#allocation4 + $0x108] ss:$12 sps:$4 sm:$0xff]   ;;  %v1649_v51 = vld [vmem:[#allocation4 + $0x124] ss:$12 sps:$4 sm:$0xff]   ;;  %v1647_v52 = vld [vmem:[#allocation4 + $0x120] ss:$12 sps:$4 sm:$0xff]  }
  0x47   :  { %896 = vmatprep.subr.bf16.mxu0 %v1611_v19  ;;  %1483 = vmatpush3.bf16.msra.mxu1 %v1636_v27  ;;  %v1654_v53 = vld [vmem:[#allocation4 + $0x13c] ss:$12 sps:$4 sm:$0xff]   ;;  %v1652_v54 = vld [vmem:[#allocation4 + $0x138] ss:$12 sps:$4 sm:$0xff]   ;;  %v1659_v55 = vld [vmem:[#allocation4 + $0x154] ss:$12 sps:$4 sm:$0xff]  }
  0x48   :  { %1484 = vmatprep.subr.bf16.mxu1 %v1640_v30  ;;  %v1660_v56 = vld [vmem:[#allocation4 + $0x158] ss:$12 sps:$4 sm:$0xff]   ;;  %v1657_v57 = vld [vmem:[#allocation4 + $0x150] ss:$12 sps:$4 sm:$0xff]   ;;  %v1662_v61 = vld [vmem:[#allocation4 + $0x168] ss:$12 sps:$4 sm:$0xff]  }
  0x49   :  { %v1661_v58 = vld [vmem:[#allocation4 + $0x98] ss:$12 sps:$4 sm:$0xff]   ;;  %v1665_v60 = vld [vmem:[#allocation4 + $0x170] ss:$12 sps:$4 sm:$0xff]   ;;  %v1670_v0 = vld [vmem:[#allocation4 + $0x248] ss:$12 sps:$4 sm:$0xff]  }
  0x4a   :  { %897 = vmatpush1.bf16.msra.mxu0 %v1609_v20  ;;  %v1664_v59 = vld [vmem:[#allocation4 + $0x16c] ss:$12 sps:$4 sm:$0xff]   ;;  %v1666_v62 = vld [vmem:[#allocation4 + $0xb0] ss:$12 sps:$4 sm:$0xff]   ;;  %v1922_v2 = vshrl.u32 %v78_v1, 7 }
  0x4b   :  { %898 = vmatprep.subr.bf16.mxu0 %v1614_v21  ;;  %1485 = vmatpush3.bf16.msra.mxu1 %v1641_v31  ;;  %v1669_v63 = vld [vmem:[#allocation4 + $0x184] ss:$12 sps:$4 sm:$0xff]  }
  0x4c   :  { %1486 = vmatprep.subr.bf16.mxu1 %v1645_v33  ;;  %v80_v3 = vsub.s32 0, %v1922_v2  ;;  %v1928_v4 = vld [vmem:[%s1963_s2] sm:$0xf]  ;;  %v84_v5 = vsub.s32 1, %v1922_v2  ;;  %v92_v6 = vsub.s32 3, %v1922_v2 }
  0x4d   :  { %v1672_v31 = vld [vmem:[#allocation4 + $0x198] ss:$12 sps:$4 sm:$0xff]   ;;  %v1679_v33 = vld [vmem:[#allocation4 + $0x1b4] ss:$12 sps:$4 sm:$0xff]  }
  0x4e   :  { %899 = vmatpush1.bf16.msra.mxu0 %v1612_v24  ;;  %v81_v7 = vrot.slane %v1928_v4, %v80_v3  ;;  %v85_v8 = vrot.slane %v1928_v4, %v84_v5  ;;  %v93_v10 = vrot.slane %v1928_v4, %v92_v6  ;;  %v1667_v24 = vld [vmem:[#allocation4 + $0x180] ss:$12 sps:$4 sm:$0xff]   ;;  %v1710_v1 = vld [vmem:[#allocation4 + $0x258] ss:$12 sps:$4 sm:$0xff]   ;;  %v1713_v6 = vld [vmem:[#allocation4 + $0x270] ss:$12 sps:$4 sm:$0xff]  }
  0x4f   :  { %900 = vmatprep.subr.bf16.mxu0 %v1617_v25  ;;  %1487 = vmatpush3.bf16.msra.mxu1 %v1646_v34  ;;  %v1671_v25 = vld [vmem:[#allocation4 + $0x188] ss:$12 sps:$4 sm:$0xff]   ;;  %v1680_v34 = vld [vmem:[#allocation4 + $0x278] ss:$12 sps:$4 sm:$0xff]  }
  0x50   :  { %1488 = vmatprep.subr.bf16.mxu1 %v1650_v36  ;;  %v1681_v36 = vld [vmem:[#allocation4 + $0x1b8] ss:$12 sps:$4 sm:$0xff]  }
  0x52   :  { %901 = vmatpush1.bf16.msra.mxu0 %v1615_v28  ;;  %v1674_v28 = vld [vmem:[#allocation4 + $0x19c] ss:$12 sps:$4 sm:$0xff]  }
  0x53   :  { %902 = vmatprep.subr.bf16.mxu0 %v1620_v29  ;;  %1489 = vmatpush3.bf16.msra.mxu1 %v1651_v38  ;;  %v1675_v29 = vld [vmem:[#allocation4 + $0x260] ss:$12 sps:$4 sm:$0xff]   ;;  %v1685_v38 = vld [vmem:[#allocation4 + $0x290] ss:$12 sps:$4 sm:$0xff]  }
  0x54   :  { %1490 = vmatprep.subr.bf16.mxu1 %v1655_v41  ;;  %v1689_v41 = vld [vmem:[#allocation4 + $0x1e4] ss:$12 sps:$4 sm:$0xff]  }
  0x56   :  { %903 = vmatpush1.bf16.msra.mxu0 %v1618_v32  ;;  %v1676_v32 = vld [vmem:[#allocation4 + $0x1a0] ss:$12 sps:$4 sm:$0xff]  }
  0x57   :  { %904 = vmatprep.subr.bf16.mxu0 %v1623_v35  ;;  %1491 = vmatpush3.bf16.msra.mxu1 %v1656_v43  ;;  %v1677_v35 = vld [vmem:[#allocation4 + $0x1b0] ss:$12 sps:$4 sm:$0xff]   ;;  %v88_v43 = vsub.s32 2, %v1922_v2 }
  0x58   :  { %1492 = vmatprep.subr.bf16.mxu1 %v1660_v56  ;;  %v1704_v56 = vld [vmem:[#allocation4 + $0x22c] ss:$12 sps:$4 sm:$0xff]   ;;  %v1749_v2 = vld [vmem:[#allocation6 + $0x90] sm:$0xff]  }
  0x5a   :  { %905 = vmatpush1.bf16.msra.mxu0 %v1621_v37  ;;  %v1684_v37 = vld [vmem:[#allocation4 + $0x1cc] ss:$12 sps:$4 sm:$0xff]  }
  0x5b   :  { %906 = vmatprep.subr.bf16.mxu0 %v1626_v39  ;;  %1493 = vmatpush3.bf16.msra.mxu1 %v1661_v58  ;;  %v1682_v39 = vld [vmem:[#allocation4 + $0x1c8] ss:$12 sps:$4 sm:$0xff]  }
  0x5c   :  { %1494 = vmatprep.subr.bf16.mxu1 %v1665_v60  ;;  %v1706_v60 = vld [vmem:[#allocation4 + $0x230] ss:$12 sps:$4 sm:$0xff]  }
  0x5e   :  { %907 = vmatpush1.bf16.msra.mxu0 %v1624_v40  ;;  %v1686_v40 = vld [vmem:[#allocation4 + $0x1d0] ss:$12 sps:$4 sm:$0xff]  }
  0x5f   :  { %908 = vmatprep.subr.bf16.mxu0 %v1629_v42  ;;  %1495 = vmatpush3.bf16.msra.mxu1 %v1666_v62  ;;  %v1690_v42 = vld [vmem:[#allocation4 + $0x2a8] ss:$12 sps:$4 sm:$0xff]  }
  0x60   :  { %1502 = vmatprep.subr.bf16.mxu1 %v1670_v0  ;;  %v1712_v0 = vld [vmem:[#allocation4 + $0x25c] ss:$12 sps:$4 sm:$0xff]  }
  0x62   :  { %909 = vmatpush1.bf16.msra.mxu0 %v1627_v44  ;;  %v1687_v44 = vld [vmem:[#allocation4 + $0x1e0] ss:$12 sps:$4 sm:$0xff]  }
  0x63   :  { %910 = vmatprep.subr.bf16.mxu0 %v1634_v45  ;;  %v1691_v45 = vld [vmem:[#allocation4 + $0x1e8] ss:$12 sps:$4 sm:$0xff]  }
  0x66   :  { %911 = vmatpush1.bf16.msra.mxu0 %v1632_v46  ;;  %v1694_v46 = vld [vmem:[#allocation4 + $0x1fc] ss:$12 sps:$4 sm:$0xff]  }
  0x67   :  { %912 = vmatprep.subr.bf16.mxu0 %v1639_v47  ;;  %v1695_v47 = vld [vmem:[#allocation4 + $0x2c0] ss:$12 sps:$4 sm:$0xff]  }
  0x6a   :  { %913 = vmatpush1.bf16.msra.mxu0 %v1637_v48  ;;  %v89_v48 = vrot.slane %v1928_v4, %v88_v43  ;;  %v1715_v4 = vld [vmem:[#allocation4 + $0x274] ss:$12 sps:$4 sm:$0xff]  }
  0x6b   :  { %914 = vmatprep.subr.bf16.mxu0 %v1644_v49  ;;  %v1692_v49 = vld [vmem:[#allocation4 + $0x1f8] ss:$12 sps:$4 sm:$0xff]  }
  0x6e   :  { %915 = vmatpush1.bf16.msra.mxu0 %v1642_v50  ;;  %v1696_v50 = vld [vmem:[#allocation4 + $0x200] ss:$12 sps:$4 sm:$0xff]  }
  0x6f   :  { %916 = vmatprep.subr.bf16.mxu0 %v1649_v51  ;;  %v1699_v51 = vld [vmem:[#allocation4 + $0x214] ss:$12 sps:$4 sm:$0xff]  }
  0x72   :  { %917 = vmatpush1.bf16.msra.mxu0 %v1647_v52  ;;  %v1700_v52 = vld [vmem:[#allocation4 + $0x2d8] ss:$12 sps:$4 sm:$0xff]  }
  0x73   :  { %918 = vmatprep.subr.bf16.mxu0 %v1654_v53 }
  0x76   :  { %919 = vmatpush1.bf16.msra.mxu0 %v1652_v54  ;;  %v1697_v54 = vld [vmem:[#allocation4 + $0x210] ss:$12 sps:$4 sm:$0xff]  }
  0x77   :  { %920 = vmatprep.subr.bf16.mxu0 %v1659_v55  ;;  %v1701_v55 = vld [vmem:[#allocation4 + $0x218] ss:$12 sps:$4 sm:$0xff]  }
  0x7a   :  { %921 = vmatpush1.bf16.msra.mxu0 %v1657_v57  ;;  %v1705_v57 = vld [vmem:[#allocation4 + $0x2f0] ss:$12 sps:$4 sm:$0xff]  }
  0x7b   :  { %922 = vmatprep.subr.bf16.mxu0 %v1664_v59  ;;  %v1702_v59 = vld [vmem:[#allocation4 + $0x228] ss:$12 sps:$4 sm:$0xff]  }
  0x7e   :  { %923 = vmatpush1.bf16.msra.mxu0 %v1662_v61  ;;  %v1709_v61 = vld [vmem:[#allocation4 + $0x244] ss:$12 sps:$4 sm:$0xff]  }
  0x7f   :  { %933 = vmatprep.subr.bf16.mxu0 %v1669_v63  ;;  %v1707_v63 = vld [vmem:[#allocation4 + $0x240] ss:$12 sps:$4 sm:$0xff]  }
 0x114   :  { %v179_v9 = vpop.f32.mrb[0].mxu0 }
 0x115   :  { %v180_v11 = vadd.f32 %v179_v9, %v81_v7  ;;  %v181_v12 = vpop.f32.mrb[1].mxu0  ;;  %v1939_v15 = vpop.f32.mrb[0].mxu1  ;;  %v1718_v7 = vld [vmem:[#allocation4 + $0x28c] ss:$12 sps:$4 sm:$0xff]   ;;  %v1721_v9 = vld [vmem:[#allocation4 + $0x2a4] ss:$12 sps:$4 sm:$0xff]  }
 0x116   :  { %v182_v13 = vadd.f32 %v181_v12, %v85_v8  ;;  %v183_v14 = vpop.f32.mrb[2].mxu0  ;;  %v222_v18 = vpop.f32.mrb[1].mxu1  ;;  %v221_v53 = vadd.f32 %v1939_v15, %v89_v48  ;;  %v1716_v8 = vld [vmem:[#allocation4 + $0x288] ss:$12 sps:$4 sm:$0xff]   ;;  %v1722_v12 = vld [vmem:[#allocation4 + $0x2b8] ss:$12 sps:$4 sm:$0xff]  }
 0x117   :  { %v227_v16 = vmax.f32 %v180_v11, 0.0  ;;  %v184_v17 = vpop.f32.mrb[3].mxu0  ;;  %v223_v20 = vadd.f32 %v222_v18, %v93_v10  ;;  %v224_v21 = vpop.f32.mrb[2].mxu1  ;;  %v1719_v10 = vld [vmem:[#allocation4 + $0x2a0] ss:$12 sps:$4 sm:$0xff]  }
 0x118   :  { %v228_v19 = vmax.f32 %v182_v13, 0.0  ;;  %v225_v22 = vpop.f32.mrb[3].mxu1  ;;  %v229_v58 = vmax.f32 %v221_v53, 0.0  ;;  %v1724_v11 = vld [vmem:[#allocation4 + $0x2bc] ss:$12 sps:$4 sm:$0xff]   ;;  %v1731_v17 = vld [vmem:[#allocation6 + $0x40] sm:$0xff]  }
 0x119   :  { %v230_v26 = vmax.f32 %v223_v20, 0.0  ;;  %v231_v27 = vpack.c.bf16 %v227_v16, %v227_v16  ;;  %v1727_v13 = vld [vmem:[#allocation4 + $0x2d4] ss:$12 sps:$4 sm:$0xff]   ;;  %v1725_v14 = vld [vmem:[#allocation4 + $0x2d0] ss:$12 sps:$4 sm:$0xff]   ;;  %v1734_v20 = vld [vmem:[#allocation6 + $0x8] sm:$0xff]  }
 0x11a   :  { %v232_v23 = vpack.c.bf16 %v228_v19, %v228_v19  ;;  %v233_v62 = vpack.c.bf16 %v229_v58, %v229_v58  ;;  %v1730_v15 = vld [vmem:[#allocation4 + $0x2ec] ss:$12 sps:$4 sm:$0xff]   ;;  %v1728_v16 = vld [vmem:[#allocation4 + $0x2e8] ss:$12 sps:$4 sm:$0xff]   ;;  %v1732_v18 = vld [vmem:[#allocation6] sm:$0xff]  }
 0x11b   :  { %v234_v30 = vpack.c.bf16 %v230_v26, %v230_v26  ;;  %v1733_v19 = vld [vmem:[#allocation6 + $0x48] sm:$0xff]   ;;  %v1735_v21 = vld [vmem:[#allocation6 + $0x50] sm:$0xff]   ;;  %v1740_v26 = vld [vmem:[#allocation6 + $0x20] sm:$0xff]  }
 0x11c   :  { %924 = vmatprep.mubr.bf16.mxu0 %v232_v23  ;;  %1006 = vmatprep.mubr.bf16.mxu1 %v232_v23  ;;  %v1736_v22 = vld [vmem:[#allocation6 + $0x10] sm:$0xff]   ;;  %v1737_v23 = vld [vmem:[#allocation6 + $0x58] sm:$0xff]  }
 0x11d   :  { %925 = vmatmul.mubr.bf16.vlgmr.msra.gmra.mrb[4].mxu0 %v231_v27  ;;  %1007 = vmatmul.mubr.bf16.vlgmr.msra.gmra.mrb[4].mxu1 %v231_v27  ;;  %v1741_v27 = vld [vmem:[#allocation6 + $0x68] sm:$0xff]  }
 0x11e   :  { %934 = vmatpush1.bf16.msra.mxu0 %v1667_v24  ;;  %1503 = vmatpush3.bf16.msra.mxu1 %v1671_v25  ;;  %v1738_v24 = vld [vmem:[#allocation6 + $0x18] sm:$0xff]   ;;  %v1739_v25 = vld [vmem:[#allocation6 + $0x60] sm:$0xff]  }
 0x11f   :  { %935 = vmatprep.subr.bf16.mxu0 %v1674_v28  ;;  %1504 = vmatprep.subr.bf16.mxu1 %v1675_v29  ;;  %v1742_v28 = vld [vmem:[#allocation6 + $0x28] sm:$0xff]   ;;  %v1743_v29 = vld [vmem:[#allocation6 + $0x70] sm:$0xff]  }
 0x120   :  { %1046 = vmatprep.mubr.bf16.mxu1 %v234_v30  ;;  %965 = vmatprep.mubr.bf16.mxu0 %v234_v30  ;;  %v1744_v30 = vld [vmem:[#allocation6 + $0x30] sm:$0xff]  }
 0x122   :  { %936 = vmatpush1.bf16.msra.mxu0 %v1672_v31  ;;  %1505 = vmatpush3.bf16.msra.mxu1 %v1676_v32  ;;  %v1745_v31 = vld [vmem:[#allocation6 + $0x78] sm:$0xff]  }
 0x123   :  { %937 = vmatprep.subr.bf16.mxu0 %v1679_v33  ;;  %1506 = vmatprep.subr.bf16.mxu1 %v1680_v34  ;;  %v1746_v32 = vld [vmem:[#allocation6 + $0x38] sm:$0xff]   ;;  %v1837_v33 = vmov 0.0  }
 0x126   :  { %938 = vmatpush1.bf16.msra.mxu0 %v1677_v35  ;;  %1507 = vmatpush3.bf16.msra.mxu1 %v1681_v36 }
 0x127   :  { %939 = vmatprep.subr.bf16.mxu0 %v1684_v37  ;;  %1508 = vmatprep.subr.bf16.mxu1 %v1685_v38 }
 0x12a   :  { %940 = vmatpush1.bf16.msra.mxu0 %v1682_v39  ;;  %1509 = vmatpush3.bf16.msra.mxu1 %v1686_v40  ;;  %v363_v39 = vld [vmem:[%s1965_s4] sm:$0x7] }
 0x12b   :  { %941 = vmatprep.subr.bf16.mxu0 %v1689_v41  ;;  %1510 = vmatprep.subr.bf16.mxu1 %v1690_v42  ;;  %v376_v40 = vrot.slane %v363_v39, %v88_v43 }
 0x12e   :  { %942 = vmatpush1.bf16.msra.mxu0 %v1687_v44  ;;  %1511 = vmatpush3.bf16.msra.mxu1 %v1691_v45 }
 0x12f   :  { %943 = vmatprep.subr.bf16.mxu0 %v1694_v46  ;;  %1512 = vmatprep.subr.bf16.mxu1 %v1695_v47 }
 0x132   :  { %944 = vmatpush1.bf16.msra.mxu0 %v1692_v49  ;;  %1513 = vmatpush3.bf16.msra.mxu1 %v1696_v50  ;;  %v368_v49 = vrot.slane %v363_v39, %v80_v3  ;;  %v372_v50 = vrot.slane %v363_v39, %v84_v5  ;;  %v1750_v3 = vld [vmem:[#allocation6 + $0x98] sm:$0xff]   ;;  %v1751_v5 = vld [vmem:[#allocation6 + $0xa0] sm:$0xff]  }
 0x133   :  { %945 = vmatprep.subr.bf16.mxu0 %v1699_v51  ;;  %1514 = vmatprep.subr.bf16.mxu1 %v1700_v52 }
 0x136   :  { %946 = vmatpush1.bf16.msra.mxu0 %v1697_v54  ;;  %1515 = vmatpush3.bf16.msra.mxu1 %v1701_v55 }
 0x137   :  { %947 = vmatprep.subr.bf16.mxu0 %v1704_v56  ;;  %1516 = vmatprep.subr.bf16.mxu1 %v1705_v57 }
 0x13a   :  { %948 = vmatpush1.bf16.msra.mxu0 %v1702_v59  ;;  %1517 = vmatpush3.bf16.msra.mxu1 %v1706_v60  ;;  %v1747_v59 = vld [vmem:[#allocation6 + $0x80] sm:$0xff]  }
 0x13b   :  { %949 = vmatprep.subr.bf16.mxu0 %v1709_v61  ;;  %1524 = vmatprep.subr.bf16.mxu1 %v1731_v17  ;;  %v1748_v61 = vld [vmem:[#allocation6 + $0x88] sm:$0xff]  }
 0x13d   :  { %1047 = vmatmul.mubr.bf16.vlgmr.msra.gmra.mrb[8].mxu1 %v233_v62 }
 0x13e   :  { %950 = vmatpush1.bf16.msra.mxu0 %v1707_v63  ;;  %1525 = vmatpush3.bf16.msra.mxu1 %v1732_v18  ;;  %v1753_v63 = vld [vmem:[#allocation6 + $0xb0] sm:$0xff]  }
 0x13f   :  { %951 = vmatprep.subr.bf16.mxu0 %v1712_v0  ;;  %1526 = vmatprep.subr.bf16.mxu1 %v1733_v19  ;;  %v1754_v0 = vld [vmem:[#allocation6 + $0xb8] sm:$0xff]  }
 0x142   :  { %952 = vmatpush1.bf16.msra.mxu0 %v1710_v1  ;;  %1527 = vmatpush3.bf16.msra.mxu1 %v1734_v20 }
 0x143   :  { %953 = vmatprep.subr.bf16.mxu0 %v1715_v4  ;;  %1528 = vmatprep.subr.bf16.mxu1 %v1735_v21 }
 0x146   :  { %954 = vmatpush1.bf16.msra.mxu0 %v1713_v6  ;;  %1529 = vmatpush3.bf16.msra.mxu1 %v1736_v22 }
 0x147   :  { %955 = vmatprep.subr.bf16.mxu0 %v1718_v7  ;;  %1530 = vmatprep.subr.bf16.mxu1 %v1737_v23 }
 0x14a   :  { %956 = vmatpush1.bf16.msra.mxu0 %v1716_v8  ;;  %1531 = vmatpush3.bf16.msra.mxu1 %v1738_v24 }
 0x14b   :  { %957 = vmatprep.subr.bf16.mxu0 %v1721_v9  ;;  %1532 = vmatprep.subr.bf16.mxu1 %v1739_v25 }
 0x14e   :  { %958 = vmatpush1.bf16.msra.mxu0 %v1719_v10  ;;  %1533 = vmatpush3.bf16.msra.mxu1 %v1740_v26 }
 0x14f   :  { %959 = vmatprep.subr.bf16.mxu0 %v1724_v11  ;;  %1534 = vmatprep.subr.bf16.mxu1 %v1741_v27  ;;  %v1455_v11 = vld [vmem:[%s1967_s6] ss:$0 sm:$0xff] }
 0x152   :  { %960 = vmatpush1.bf16.msra.mxu0 %v1722_v12  ;;  %1535 = vmatpush3.bf16.msra.mxu1 %v1742_v28 }
 0x153   :  { %961 = vmatprep.subr.bf16.mxu0 %v1727_v13  ;;  %1536 = vmatprep.subr.bf16.mxu1 %v1743_v29 }
 0x156   :  { %962 = vmatpush1.bf16.msra.mxu0 %v1725_v14  ;;  %1537 = vmatpush3.bf16.msra.mxu1 %v1744_v30 }
 0x157   :  { %963 = vmatprep.subr.bf16.mxu0 %v1730_v15  ;;  %1538 = vmatprep.subr.bf16.mxu1 %v1745_v31 }
 0x15a   :  { %964 = vmatpush1.bf16.msra.mxu0 %v1728_v16  ;;  %1539 = vmatpush3.bf16.msra.mxu1 %v1746_v32 }
 0x15b   :  { %1555 = vmatprep.subr.bf16.mxu1 %v1837_v33 }
 0x15d   :  { %966 = vmatmul.mubr.bf16.vlgmr.msra.gmra.mrb[4].mxu0 %v233_v62  ;;  %v1752_v62 = vld [vmem:[#allocation6 + $0xa8] sm:$0xff]  }
 0x1f0   :  { %v1496_v34 = vpop.f32.mrb[4].mxu1 }
 0x1f1   :  { %v1497_v35 = vpop.f32.mrb[5].mxu1 }
 0x1f2   :  { %v1498_v36 = vadd.f32 %v1497_v35, %v1496_v34  ;;  %v1499_v37 = vpop.f32.mrb[6].mxu1 }
 0x1f3   :  { %v1500_v38 = vpop.f32.mrb[7].mxu1 }
 0x1f4   :  { %v1009_v44 = vadd.f32 %v1498_v36, %v376_v40 }
 0x210   :  { %v1518_v41 = vpop.f32.mrb[8].mxu1 }
 0x211   :  { %v1519_v42 = vpop.f32.mrb[9].mxu1 }
 0x212   :  { %v1520_v45 = vadd.f32 %v1519_v42, %v1518_v41  ;;  %v1521_v46 = vpop.f32.mrb[10].mxu1 }
 0x213   :  { %v1522_v47 = vpop.f32.mrb[11].mxu1 }
 0x214   :  { %v1049_v48 = vadd.f32 %v1520_v45, %v1009_v44 }
 0x216   :  { %v1056_v1 = vmax.f32 %v1049_v48, 0.0 }
 0x218   :  { %v1059_v4 = vpack.c.bf16 %v1056_v1, %v1056_v1 }
 0x230   :  { %v967_v51 = vpop.f32.mrb[4].mxu0 }
 0x231   :  { %v1575_v52 = vadd.f32 %v967_v51, %v368_v49  ;;  %v969_v53 = vpop.f32.mrb[5].mxu0 }
 0x232   :  { %v1576_v54 = vadd.f32 %v969_v53, %v372_v50  ;;  %v971_v55 = vpop.f32.mrb[6].mxu0 }
 0x233   :  { %v1054_v56 = vmax.f32 %v1575_v52, 0.0  ;;  %v972_v43 = vpop.f32.mrb[7].mxu0 }
 0x234   :  { %v1055_v57 = vmax.f32 %v1576_v54, 0.0 }
 0x235   :  { %v1057_v60 = vpack.c.bf16 %v1054_v56, %v1054_v56 }
 0x236   :  { %v1058_v58 = vpack.c.bf16 %v1055_v57, %v1055_v57 }
 0x238   :  { %1291 = vmatprep.mubr.bf16.mxu1 %v1058_v58 }
 0x239   :  { %1292 = vmatmul.mubr.bf16.vlgmr.msra.gmra.mrb[12].mxu1 %v1057_v60 }
 0x23a   :  { %1556 = vmatpush3.bf16.msra.mxu1 %v1747_v59  ;;  %1571 = vmatprep.mubr.msk.bf16.mxu1 %vm1838_vm2, %v1837_v33 }
 0x23b   :  { %1557 = vmatprep.subr.bf16.mxu1 %v1837_v33 }
 0x23e   :  { %1558 = vmatpush3.bf16.msra.mxu1 %v1748_v61 }
 0x23f   :  { %1559 = vmatprep.subr.bf16.mxu1 %v1837_v33 }
 0x242   :  { %1560 = vmatpush3.bf16.msra.mxu1 %v1749_v2 }
 0x243   :  { %1561 = vmatprep.subr.bf16.mxu1 %v1837_v33 }
 0x246   :  { %1562 = vmatpush3.bf16.msra.mxu1 %v1750_v3 }
 0x247   :  { %1563 = vmatprep.subr.bf16.mxu1 %v1837_v33 }
 0x24a   :  { %1564 = vmatpush3.bf16.msra.mxu1 %v1751_v5 }
 0x24b   :  { %1565 = vmatprep.subr.bf16.mxu1 %v1837_v33 }
 0x24e   :  { %1566 = vmatpush3.bf16.msra.mxu1 %v1752_v62 }
 0x24f   :  { %1567 = vmatprep.subr.bf16.mxu1 %v1837_v33 }
 0x252   :  { %1568 = vmatpush3.bf16.msra.mxu1 %v1753_v63 }
 0x253   :  { %1569 = vmatprep.subr.bf16.mxu1 %v1837_v33 }
 0x256   :  { %1570 = vmatpush3.bf16.msra.mxu1 %v1754_v0 }
 0x259   :  { %1572 = vmatmul.mubr.bf16.vlgmr.msra.gmra.mrb[16].mxu1 %v1059_v4 }
 0x30c   :  { %v1540_v6 = vpop.f32.mrb[12].mxu1 }
 0x30d   :  { %v1541_v7 = vpop.f32.mrb[13].mxu1 }
 0x30e   :  { %v1542_v8 = vadd.f32 %v1541_v7, %v1540_v6  ;;  %v1543_v9 = vpop.f32.mrb[14].mxu1 }
 0x30f   :  { %v1544_v10 = vpop.f32.mrb[15].mxu1 }
 0x310   :  { %v1294_v12 = vadd.f32 %v1542_v8, %v1455_v11 }
 0x32c   :  { %v1333_v13 = vpop.f32.mrb[16].mxu1 }
 0x32d   :  { %v1334_v14 = vadd.f32 %v1333_v13, %v1294_v12  ;;  %v1573_v15 = vpop.f32.mrb[17].mxu1 }
 0x32e   :  { %v1336_v16 = vpop.f32.mrb[18].mxu1 }
 0x32f   :  { %1755 = vtanh.f32 %v1334_v14  ;;  %v1574_v17 = vpop.f32.mrb[19].mxu1 }
 0x339   :  { %v1756_v18 = vpop.eup %1755 }
 0x33a   :  { %1340 = vst [vmem:[%s1968_s7] sm:$0xff] %v1756_v18 }
 0x33b   :  { %1345 = vsyncpa [#allocation3], 1 }
 0x33c   :  { %1346 = vsyncpa [#allocation5], 1 }

</bundles_post_ra>
